<compile_context>
chip_gen: v5e
topology: v5e:2x2
jax: 0.10.0
libtpu: 0.0.40
codegen_flags: <defaults>
</compile_context>

<pallas_src>
import functools

import jax
import jax.numpy as jnp
from jax import lax
from jax.experimental import pallas as pl
from jax.experimental.pallas import tpu as pltpu


def _round_up(a, b):
    return ((a + b - 1) // b) * b


def _vmem_capacity_bytes():
    try:
        return int(pltpu.get_tpu_info().vmem_capacity_bytes)
    except Exception:
        return 64 * 1024 * 1024  # conservative fallback (v7x per-TensorCore size)


def _pick_tile_rows(rows, h_pad, itemsize, row_align, budget):
    """Largest row tile whose double-buffered tiles + f32 temps fit `budget`."""
    # Per row: double-buffered input tile + double-buffered output tile plus
    # ~5 full-width f32 temporaries Mosaic may materialize (x cast, d, d*d,
    # scaled result, spill slack).
    bytes_per_row = 4 * h_pad * itemsize + 5 * h_pad * 4
    t = budget // max(bytes_per_row, 1)
    # VMEM-driven cap rather than a fixed 1024: small/medium hidden sizes get
    # large row tiles so the per-step pipeline overhead is amortized.
    t = min(t, 4096)
    # Never larger than the (sublane-aligned) number of rows we actually have.
    t = min(t, _round_up(rows, row_align))
    # Multiple of the sublane packing (8 rows f32, 16 bf16, 32 int8/fp8).
    t = max(row_align, (t // row_align) * row_align)
    return int(t)


def layernorm_kernel(x_ref, w_ref, b_ref, o_ref, *, eps, h_actual):
    x = x_ref[...].astype(jnp.float32)                   # (tile_rows, H_pad)
    h_pad = x.shape[-1]
    inv_h = 1.0 / float(h_actual)

    # Padded lanes of x are zero (zero-padded in the wrapper), so summing over
    # H_pad and dividing by the true H gives the correct mean without a mask.
    u = jnp.sum(x, axis=-1, keepdims=True) * inv_h       # mean over hidden
    d = x - u
    ss = jnp.sum(d * d, axis=-1, keepdims=True)
    if h_pad != h_actual:
        # Padded lanes of d are exactly -u; remove their contribution
        # analytically instead of an iota+select full-tile mask (saves two
        # VPU passes per step, exact algebraically).
        ss = ss - float(h_pad - h_actual) * (u * u)
    s = ss * inv_h                                        # biased variance (.pow(2).mean)
    inv = lax.rsqrt(s + eps)                              # EUP rsqrt, off the VPU path

    # weight / bias were pre-cast to f32 (1, H_pad) in the wrapper; padded
    # lanes of both are zero, so padded output lanes are zeroed.
    o_ref[...] = (w_ref[...] * (d * inv) + b_ref[...]).astype(o_ref.dtype)


def layer_norm(x, weight, bias, eps=1e-12):
    orig_shape = x.shape
    H = orig_shape[-1]
    x2 = x.reshape(-1, H)
    R = x2.shape[0]

    itemsize = jnp.dtype(x.dtype).itemsize
    row_align = max(8, 32 // max(itemsize, 1))            # 8 f32, 16 bf16, 32 int8
    H_pad = H if H % 128 == 0 else _round_up(H, 128)      # lane-dense last dim

    # Generation-aware VMEM sizing: ~5/8 of physical VMEM as the tile budget,
    # ~3/4 as the scoped limit (=> ~80/96 MiB on v5e/v6e, ~40/48 MiB on v7x).
    vmem_cap = _vmem_capacity_bytes()
    budget = min((vmem_cap * 5) // 8, 80 * 1024 * 1024)
    vmem_limit = min((vmem_cap * 3) // 4, 100 * 1024 * 1024)

    # TODO(synk): very large hidden sizes (where even row_align rows of f32
    # temps exceed VMEM) would need a hidden-dim split with a two-pass reduction.
    tile_rows = _pick_tile_rows(R, H_pad, itemsize, row_align, budget)
    steps = pl.cdiv(R, tile_rows)
    if steps > 1 and steps % 2 == 1:
        # Even step count so both v7x TensorCores get equal work under the
        # "parallel" grid axis; on single-TC chips this only slightly shrinks
        # an already large tile.
        target = steps + 1
        tile_rows = max(row_align, _round_up(pl.cdiv(R, target), row_align))
        steps = pl.cdiv(R, tile_rows)

    # Only pad the hidden dim when it is not lane-aligned; rows are left
    # ragged (no R pad, no output row slice).
    if H_pad != H:
        x2 = jnp.pad(x2, ((0, 0), (0, H_pad - H)))
    w2 = jnp.pad(weight.astype(jnp.float32).reshape(1, H), ((0, 0), (0, H_pad - H)))
    b2 = jnp.pad(bias.astype(jnp.float32).reshape(1, H), ((0, 0), (0, H_pad - H)))

    kernel = functools.partial(layernorm_kernel, eps=eps, h_actual=H)

    out = pl.pallas_call(
        kernel,
        out_shape=jax.ShapeDtypeStruct((R, H_pad), x.dtype),
        grid_spec=pltpu.PrefetchScalarGridSpec(
            num_scalar_prefetch=0,
            grid=(steps,),
            in_specs=[
                pl.BlockSpec((tile_rows, H_pad), lambda i: (i, 0)),
                pl.BlockSpec((1, H_pad), lambda i: (0, 0)),   # weight, resident
                pl.BlockSpec((1, H_pad), lambda i: (0, 0)),   # bias, resident
            ],
            out_specs=pl.BlockSpec((tile_rows, H_pad), lambda i: (i, 0)),
        ),
        compiler_params=pltpu.CompilerParams(
            dimension_semantics=("parallel",),
            vmem_limit_bytes=int(vmem_limit),
        ),
        cost_estimate=pl.CostEstimate(
            flops=10 * R * H,
            transcendentals=R,
            bytes_accessed=2 * R * H * itemsize + 2 * H * 4,
        ),
    )(x2, w2, b2)

    if H_pad != H:
        out = out[:, :H]
    return out.reshape(orig_shape)


def layer_norm_ref(x, weight, bias, eps=1e-12):
    u = jnp.mean(x, axis=-1, keepdims=True)
    s = jnp.mean((x - u) ** 2, axis=-1, keepdims=True)
    y = (x - u) / jnp.sqrt(s + eps)
    return weight * y + bias


if __name__ == "__main__":
    key = jax.random.PRNGKey(0)
    B, S, H = 2, 8, 32
    x = jax.random.normal(key, (B, S, H), dtype=jnp.float32)

    # deterministic parameter init matching nn.Parameter(torch.ones/zeros(hidden_size))
    weight = jnp.ones((H,), dtype=jnp.float32)
    bias = jnp.zeros((H,), dtype=jnp.float32)

    out = layer_norm(x, weight, bias, eps=1e-12)
    out = jax.block_until_ready(out)

    ref = layer_norm_ref(x, weight, bias, eps=1e-12)
    assert out.shape == x.shape
    assert jnp.allclose(out, ref, atol=1e-5, rtol=1e-5), "mismatch vs reference"

    print("KERNEL_OK")
</pallas_src>

<mosaic_0001>
module attributes {stable_mosaic.version = 11 : i64} {
  func.func @layernorm_kernel(%arg0: i32, %arg1: memref<16x128xf32, #tpu.memory_space<vmem>>, %arg2: memref<1x128xf32, #tpu.memory_space<vmem>>, %arg3: memref<1x128xf32, #tpu.memory_space<vmem>>, %arg4: memref<16x128xf32, #tpu.memory_space<vmem>>) attributes {dimension_semantics = [#tpu.dimension_semantics<parallel>], iteration_bounds = array<i64: 1>, scalar_prefetch = 0 : i64, scratch_operands = 0 : i64, tpu.core_type = #tpu.core_type<tc>, window_params = [{transform_indices = @transform_0, window_bounds = array<i64: 16, 128>}, {pipeline_mode = #tpu.pipeline_mode<synchronous>, transform_indices = @transform_1, window_bounds = array<i64: 1, 128>}, {pipeline_mode = #tpu.pipeline_mode<synchronous>, transform_indices = @transform_2, window_bounds = array<i64: 1, 128>}, {transform_indices = @transform_3, window_bounds = array<i64: 16, 128>}]} {
    %c0 = arith.constant 0 : index
    %c0_0 = arith.constant 0 : index
    %0 = vector.load %arg1[%c0, %c0_0] : memref<16x128xf32, #tpu.memory_space<vmem>>, vector<16x128xf32>
    %cst = arith.constant dense<0.000000e+00> : vector<16xf32>
    %1 = vector.multi_reduction <add>, %0, %cst [1] : vector<16x128xf32> to vector<16xf32>
    %2 = vector.shape_cast %1 : vector<16xf32> to vector<16x1xf32>
    %cst_1 = arith.constant 3.125000e-02 : f32
    %3 = vector.broadcast %cst_1 : f32 to vector<16x1xf32>
    %4 = arith.mulf %2, %3 : vector<16x1xf32>
    %5 = vector.broadcast %4 : vector<16x1xf32> to vector<16x128xf32>
    %6 = arith.subf %0, %5 : vector<16x128xf32>
    %7 = arith.mulf %6, %6 : vector<16x128xf32>
    %cst_2 = arith.constant dense<0.000000e+00> : vector<16xf32>
    %8 = vector.multi_reduction <add>, %7, %cst_2 [1] : vector<16x128xf32> to vector<16xf32>
    %9 = vector.shape_cast %8 : vector<16xf32> to vector<16x1xf32>
    %10 = arith.mulf %4, %4 : vector<16x1xf32>
    %cst_3 = arith.constant 9.600000e+01 : f32
    %11 = vector.broadcast %cst_3 : f32 to vector<16x1xf32>
    %12 = arith.mulf %11, %10 : vector<16x1xf32>
    %13 = arith.subf %9, %12 : vector<16x1xf32>
    %cst_4 = arith.constant 3.125000e-02 : f32
    %14 = vector.broadcast %cst_4 : f32 to vector<16x1xf32>
    %15 = arith.mulf %13, %14 : vector<16x1xf32>
    %cst_5 = arith.constant 9.99999996E-13 : f32
    %16 = vector.broadcast %cst_5 : f32 to vector<16x1xf32>
    %17 = arith.addf %15, %16 : vector<16x1xf32>
    %18 = math.rsqrt %17 : vector<16x1xf32>
    %c0_6 = arith.constant 0 : index
    %c0_7 = arith.constant 0 : index
    %19 = vector.load %arg2[%c0_6, %c0_7] : memref<1x128xf32, #tpu.memory_space<vmem>>, vector<1x128xf32>
    %20 = vector.broadcast %18 : vector<16x1xf32> to vector<16x128xf32>
    %21 = arith.mulf %6, %20 : vector<16x128xf32>
    %22 = vector.broadcast %19 : vector<1x128xf32> to vector<16x128xf32>
    %23 = arith.mulf %22, %21 : vector<16x128xf32>
    %c0_8 = arith.constant 0 : index
    %c0_9 = arith.constant 0 : index
    %24 = vector.load %arg3[%c0_8, %c0_9] : memref<1x128xf32, #tpu.memory_space<vmem>>, vector<1x128xf32>
    %25 = vector.broadcast %24 : vector<1x128xf32> to vector<16x128xf32>
    %26 = arith.addf %23, %25 : vector<16x128xf32>
    %c0_10 = arith.constant 0 : index
    %c0_11 = arith.constant 0 : index
    %27 = vector.load %arg4[%c0_10, %c0_11] : memref<16x128xf32, #tpu.memory_space<vmem>>, vector<16x128xf32>
    tpu.vector_store %arg4[%c0_10, %c0_11], %26 {strides = array<i32>} : memref<16x128xf32, #tpu.memory_space<vmem>>, vector<16x128xf32>,
    return
  }
  func.func @transform_0(%arg0: i32) -> (i32, i32) {
    %c0_i32 = arith.constant 0 : i32
    %c0_i32_0 = arith.constant 0 : i32
    return %arg0, %c0_i32 : i32, i32
  }
  func.func @transform_1(%arg0: i32) -> (i32, i32) {
    %c0_i32 = arith.constant 0 : i32
    %c0_i32_0 = arith.constant 0 : i32
    %c0_i32_1 = arith.constant 0 : i32
    return %c0_i32, %c0_i32_0 : i32, i32
  }
  func.func @transform_2(%arg0: i32) -> (i32, i32) {
    %c0_i32 = arith.constant 0 : i32
    %c0_i32_0 = arith.constant 0 : i32
    %c0_i32_1 = arith.constant 0 : i32
    return %c0_i32, %c0_i32_0 : i32, i32
  }
  func.func @transform_3(%arg0: i32) -> (i32, i32) {
    %c0_i32 = arith.constant 0 : i32
    %c0_i32_0 = arith.constant 0 : i32
    return %arg0, %c0_i32 : i32, i32
  }
}

</mosaic_0001>

<bundles_post_ra>
// kernel: tpu_custom_call.1
= control target key start
LH: loop header
LB: loop body
LE: loop exit
PB: predicated region body
PF: predicated region fallthrough
CT: control target
= control target key end

     0   :  { %8 = vsyncpa [#allocation3], 0  ;;  %s259_s0 = inlined_call_operand.hbm [shape: f32[16,128], index: 0, kind: input, shape index: {}]   ;;  %s260_s1 = inlined_call_operand.hbm [shape: f32[1,128], index: 1, kind: input, shape index: {}]   ;;  %s261_s2 = inlined_call_operand.vmem [shape: f32[1,128], index: 2, kind: input, shape index: {}]   ;;  %s262_s3 = inlined_call_operand.hbm [shape: f32[16,128], index: 3, kind: output, shape index: {}]  }
   0x1   :  { %9 = vsyncpa [#allocation6], 0 }
   0x2   :  { %10 = vsyncpa [#allocation4], 0  ;;  %s15_s14 = sshll.u32 %s259_s0, 4  ;;  %s216_s15 = smov [#allocation2]   ;;  %s16_s14 = int_to_ptr.hbm [resolvable:$true] %s15_s14 }
   0x3   :  { %s17_s16 = sshll.u32 %s216_s15, 4  ;;  %s29_s19 = sshll.u32 %s260_s1, 4  ;;  %s18_s16 = int_to_ptr.vmem [resolvable:$true] %s17_s16  ;;  %s30_s19 = int_to_ptr.hbm [resolvable:$true] %s29_s19 }
   0x4   :  { %s217_s20 = smov 128   ;;  %s218_s21 = smov 8  }
   0x5   :  { %23 = dma.hbm_to_vmem [thread:$0]  %s16_s14, 256, %s18_s16, [#allocation3], %s217_s20, %s217_s20, %s218_s21  }
   0x6   :  { %s219_s22 = smov [#allocation5]  }
   0x7   :  { %s31_s23 = sshll.u32 %s219_s22, 4  ;;  %s32_s23 = int_to_ptr.vmem [resolvable:$true] %s31_s23 }
   0x8   :  { %34 = dma.hbm_to_vmem [thread:$0]  %s30_s19, 16, %s32_s23, [#allocation6]  }
   0x9   :  { %210 = dma.done.wait [#allocation3], 256  }
   0xa   :  { %211 = vsyncadd [#allocation3], 4294967040 }
   0xb   :  { %212 = dma.done.wait [#allocation6], 16  }
   0xc   :  { %213 = vsyncadd [#allocation6], 4294967280  ;;  %v45_v0 = vld [vmem:[#allocation2] sm:$0xff]  ;;  %v46_v1 = vld [vmem:[#allocation2 + $0x8] sm:$0xff]  ;;  %s220_s24 = smov [#allocation7]   ;;  %s113_s28 = sshll.u32 %s262_s3, 4  ;;  %s114_s28 = int_to_ptr.hbm [resolvable:$true] %s113_s28 }
   0xd   :  { %47 = vadd.xlane.f32.xlu0 %v45_v0  ;;  %v132_v30 = vld [vmem:[#allocation5] ss:$0 sm:$0xff]  ;;  %v133_v34 = vld [vmem:[%s261_s2] ss:$0 sm:$0xff]  ;;  %s111_s25 = sshll.u32 %s220_s24, 4  ;;  %s112_s25 = int_to_ptr.vmem [resolvable:$true] %s111_s25 }
  0x15   :  { %49 = vadd.xlane.f32.xlu0 %v46_v1 }
  0x80   :  { %v48_v2 = vpop.xlane.xlu0 %47 }
  0x81   :  { %v51_v3 = vmul.f32 0.03125, %v48_v2 }
  0x83   :  { %v53_v4 = vsub.f32 %v45_v0, %v51_v3  ;;  %v61_v10 = vmul.f32 %v51_v3, %v51_v3 }
  0x85   :  { %v55_v5 = vmul.f32 %v53_v4, %v53_v4  ;;  %v63_v11 = vmul.f32 96.0, %v61_v10 }
  0x87   :  { %57 = vadd.xlane.f32.xlu1 %v55_v5 }
  0x88   :  { %v50_v6 = vpop.xlane.xlu0 %49 }
  0x89   :  { %v52_v7 = vmul.f32 0.03125, %v50_v6 }
  0x8b   :  { %v54_v8 = vsub.f32 %v46_v1, %v52_v7  ;;  %v62_v14 = vmul.f32 %v52_v7, %v52_v7 }
  0x8d   :  { %v56_v9 = vmul.f32 %v54_v8, %v54_v8  ;;  %v64_v17 = vmul.f32 96.0, %v62_v14 }
  0x8f   :  { %59 = vadd.xlane.f32.xlu1 %v56_v9 }
  0xfa   :  { %v58_v12 = vpop.xlane.xlu1 %57 }
  0xfb   :  { %v65_v13 = vsub.f32 %v58_v12, %v63_v11 }
  0xfd   :  { %v67_v15 = vmul.f32 0.03125, %v65_v13 }
  0xff   :  { %v69_v16 = vadd.f32 1e-12, %v67_v15 }
 0x101   :  { %134 = vrsqrt.f32 %v69_v16  ;;  %vm77_vm1 = vweird.f32 %v69_v16 }
 0x102   :  { %v60_v18 = vpop.xlane.xlu1 %59 }
 0x103   :  { %v66_v19 = vsub.f32 %v60_v18, %v64_v17 }
 0x105   :  { %v68_v20 = vmul.f32 0.03125, %v66_v19 }
 0x107   :  { %v135_v21 = vpop.eup %134  ;;  %v70_v22 = vadd.f32 1e-12, %v68_v20 }
 0x108   :  { %v72_v23 = vmul.f32 %v135_v21, %v69_v16  ;;  %vm78_vm0 = vweird.f32 %v135_v21 }
 0x109   :  { %136 = vrsqrt.f32 %v70_v22  ;;  %vm79_vm2 = vmor %vm77_vm1, %vm78_vm0  ;;  %vm87_vm4 = vweird.f32 %v70_v22 }
 0x10a   :  { %v73_v24 = vmul.f32 %v135_v21, %v72_v23 }
 0x10c   :  { %v74_v25 = vmul.f32 0.5, %v73_v24 }
 0x10e   :  { %v75_v26 = vsub.f32 1.5, %v74_v25 }
 0x10f   :  { %v137_v27 = vpop.eup %136 }
 0x110   :  { %v76_v28 = vmul.f32 %v135_v21, %v75_v26  ;;  %v82_v29 = vmul.f32 %v137_v27, %v70_v22  ;;  %vm88_vm3 = vweird.f32 %v137_v27 }
 0x111   :  { %vm89_vm5 = vmor %vm87_vm4, %vm88_vm3 }
 0x112   :  { %v80_v31 = vsel %vm79_vm2, %v135_v21, %v76_v28  ;;  %v83_v32 = vmul.f32 %v137_v27, %v82_v29 }
 0x113   :  { %v92_v33 = vmul.f32 %v80_v31, %v53_v4 }
 0x114   :  { %v84_v35 = vmul.f32 0.5, %v83_v32 }
 0x115   :  { %v97_v36 = vmul.f32 %v132_v30, %v92_v33 }
 0x116   :  { %v85_v37 = vsub.f32 1.5, %v84_v35 }
 0x117   :  { %v103_v38 = vadd.f32 %v133_v34, %v97_v36 }
 0x118   :  { %v86_v39 = vmul.f32 %v137_v27, %v85_v37 }
 0x119   :  { %105 = vst [vmem:[#allocation7] sm:$0xff] %v103_v38 }
 0x11a   :  { %v90_v40 = vsel %vm89_vm5, %v137_v27, %v86_v39 }
 0x11b   :  { %v93_v41 = vmul.f32 %v90_v40, %v54_v8 }
 0x11d   :  { %v98_v42 = vmul.f32 %v132_v30, %v93_v41 }
 0x11f   :  { %v104_v43 = vadd.f32 %v133_v34, %v98_v42 }
 0x121   :  { %106 = vst [vmem:[#allocation7 + $0x8] sm:$0xff] %v104_v43 }
 0x122   :  { %119 = dma.vmem_to_hbm [thread:$0]  %s112_s25, 256, %s114_s28, [#allocation4], %s217_s20, %s217_s20, %s218_s21  }
 0x123   :  { %214 = dma.done.wait [#allocation4], 256  }
 0x124   :  { %215 = vsyncadd [#allocation4], 4294967040 }
 0x125   :  { %124 = vsyncpa [#allocation3], 1 }
 0x126   :  { %125 = vsyncpa [#allocation6], 1 }
 0x127   :  { %126 = vsyncpa [#allocation4], 1 }

</bundles_post_ra>
